<compile_context>
chip_gen: v6e
topology: v6e:2x2x1
jax: 0.10.0
libtpu: 0.0.40
codegen_flags: <defaults>
</compile_context>

<pallas_src>
import functools

import jax
import jax.numpy as jnp
from jax.experimental import pallas as pl
from jax.experimental.pallas import tpu as pltpu

LANE = 128
SUBLANE = 8
BASE_TILE = SUBLANE * LANE        # 1024 elems: (8,128) granularity
MAX_GROUP_ROWS = 64               # accumulator height (multiple of 8, <= 64)


def _device_profile():
    """(multi_tensorcore, in-flight input-VMEM budget bytes, row cap)."""
    try:
        kind = jax.devices()[0].device_kind.lower()
    except Exception:  # pragma: no cover - defensive
        kind = ""
    multi_tc = "v7" in kind                      # 2 TCs/chip only on v7x
    if ("v6" in kind) or ("v7" in kind):
        return multi_tc, 12 << 20, 8192          # 2 MiB/block f32, fits 32 MiB scoped
    return multi_tc, 6 << 20, 4096               # v5e/unknown: fits 16 MiB scoped


def _pick_group(row_tile):
    """Largest multiple of 8 that is <= 64 and divides row_tile."""
    for g in range(MAX_GROUP_ROWS, 0, -SUBLANE):
        if row_tile % g == 0:
            return g
    return SUBLANE


def _smooth_l1_elem(pred_f32, targ_f32, beta):
    """Branch-free smooth L1 (identical values to the where() formulation)."""
    diff = jnp.abs(pred_f32 - targ_f32)
    m = jnp.minimum(diff, beta)
    return (0.5 / beta) * m * m + (diff - m)


def _smooth_l1_kernel(*refs, beta, rows, row_tile, group, blocks_per_shard,
                      total_blocks, mask_needed, has_weight):
    if has_weight:
        pred_ref, targ_ref, w_ref, out_ref = refs
    else:
        pred_ref, targ_ref, out_ref = refs
        w_ref = None

    c = pl.program_id(0)   # core shard   ("parallel"; >1 only on v7x)
    i = pl.program_id(1)   # block index  ("arbitrary", reduction axis)

    @pl.when(i == 0)
    def _():
        out_ref[...] = jnp.zeros_like(out_ref)

    loss = _smooth_l1_elem(pred_ref[...].astype(jnp.float32),
                           targ_ref[...].astype(jnp.float32), beta)
    if has_weight:
        loss = loss * w_ref[...].astype(jnp.float32)

    def accumulate(x):
        # (row_tile,128) -> (group,128) sublane-group reduce: short, independent
        # VALU chains accumulated into the VMEM-resident output block.
        out_ref[...] += x.reshape(-1, group, LANE).sum(axis=0)

    if mask_needed:
        blk = c * blocks_per_shard + i
        is_edge = blk >= total_blocks - 1   # partial last block / clamped duplicates

        @pl.when(jnp.logical_not(is_edge))
        def _():
            accumulate(loss)                # interior blocks: no masking cost

        @pl.when(is_edge)
        def _():
            row0 = blk * row_tile
            row_idx = row0 + jax.lax.broadcasted_iota(jnp.int32, loss.shape, 0)
            accumulate(jnp.where(row_idx < rows, loss, 0.0))
    else:
        accumulate(loss)


def _xla_loss_sum(pred, target, weight, beta):
    loss = _smooth_l1_elem(pred.astype(jnp.float32), target.astype(jnp.float32),
                           beta)
    if weight is not None:
        loss = loss * weight.astype(jnp.float32)
    return loss.sum()


def smooth_l1_loss(pred, target, weight=None, avg_factor=None,
                   *, beta=1.0, reduction="mean", loss_weight=1.0):
    assert reduction in ("mean", "sum")
    assert pred.shape == target.shape
    beta = float(beta)
    assert beta > 0.0, "beta must be > 0"
    has_weight = weight is not None

    pred_f = pred.reshape(-1)
    targ_f = target.reshape(-1)
    w_f = weight.reshape(-1) if has_weight else None

    n = pred_f.shape[0]
    aligned = (n // BASE_TILE) * BASE_TILE
    tail = n - aligned

    total = jnp.float32(0.0)

    if aligned:
        rows = aligned // LANE                       # multiple of 8
        multi_tc, input_budget, row_cap = _device_profile()

        bytes_per_row = LANE * (pred_f.dtype.itemsize + targ_f.dtype.itemsize
                                + (w_f.dtype.itemsize if has_weight else 0))
        row_tile = input_budget // (2 * bytes_per_row)      # 2 = double buffering
        row_tile = max(SUBLANE, min(row_cap, (row_tile // SUBLANE) * SUBLANE))
        row_tile = min(row_tile, rows)
        group = _pick_group(row_tile)

        total_blocks = -(-rows // row_tile)
        num_shards = 2 if (multi_tc and total_blocks >= 2) else 1
        blocks_per_shard = -(-total_blocks // num_shards)
        mask_needed = (num_shards * blocks_per_shard * row_tile) != rows

        def in_map(c, i):
            blk = c * blocks_per_shard + i
            if mask_needed:
                blk = jnp.minimum(blk, total_blocks - 1)   # clamp; masked in-kernel
            return (blk, 0)

        def as_slab(x):
            # Aligned case: pure bitcast. Unaligned: prefix view of the flat array.
            return (x if not tail else x[:aligned]).reshape(rows, LANE)

        inputs = [as_slab(pred_f), as_slab(targ_f)]
        in_specs = [pl.BlockSpec((row_tile, LANE), in_map),
                    pl.BlockSpec((row_tile, LANE), in_map)]
        if has_weight:
            inputs.append(as_slab(w_f))
            in_specs.append(pl.BlockSpec((row_tile, LANE), in_map))

        kernel = functools.partial(
            _smooth_l1_kernel, beta=beta, rows=rows, row_tile=row_tile,
            group=group, blocks_per_shard=blocks_per_shard,
            total_blocks=total_blocks, mask_needed=mask_needed,
            has_weight=has_weight)

        partials = pl.pallas_call(
            kernel,
            out_shape=jax.ShapeDtypeStruct((num_shards * group, LANE),
                                           jnp.float32),
            grid_spec=pltpu.PrefetchScalarGridSpec(
                num_scalar_prefetch=0,
                grid=(num_shards, blocks_per_shard),
                in_specs=in_specs,
                out_specs=pl.BlockSpec((group, LANE), lambda c, i: (c, 0)),
            ),
            compiler_params=pltpu.CompilerParams(
                dimension_semantics=("parallel", "arbitrary")),
        )(*inputs)

        total = total + jnp.sum(partials)

    if tail:
        # <=1023 trailing elements: trivial XLA epilogue, no padding copy.
        total = total + _xla_loss_sum(pred_f[aligned:], targ_f[aligned:],
                                      w_f[aligned:] if has_weight else None,
                                      beta)

    total = total * jnp.float32(loss_weight)
    if reduction == "mean" and avg_factor is not None:
        return total / jnp.float32(avg_factor)
    # Matches the spec module: 'sum', or 'mean' without avg_factor -> plain sum.
    return total


def _reference(pred, target, weight=None, avg_factor=None,
               *, beta=1.0, reduction="mean", loss_weight=1.0):
    pred = pred.astype(jnp.float32)
    target = target.astype(jnp.float32)
    diff = jnp.abs(pred - target)
    loss = jnp.where(diff < beta, 0.5 * diff * diff / beta, diff - 0.5 * beta)
    loss = loss * loss_weight
    if weight is not None:
        loss = loss * weight.astype(jnp.float32)
    if reduction == "mean" and avg_factor is not None:
        return loss.sum() / avg_factor
    return loss.sum()


if __name__ == "__main__":
    key = jax.random.PRNGKey(0)
    k1, k2, k3, k4, k5, k6, k7 = jax.random.split(key, 7)

    # Case 1: mean with avg_factor and per-element weight (NCHW-ish small map,
    # 1024-aligned -> zero-copy bitcast path).
    shape = (2, 4, 16, 16)
    pred = jax.random.normal(k1, shape, dtype=jnp.float32)
    target = jax.random.normal(k2, shape, dtype=jnp.float32)
    weight = (jax.random.uniform(k3, shape) > 0.5).astype(jnp.float32)
    out1 = smooth_l1_loss(pred, target, weight=weight, avg_factor=37.0,
                          beta=1.0, reduction="mean", loss_weight=1.0)
    ref1 = _reference(pred, target, weight=weight, avg_factor=37.0,
                      beta=1.0, reduction="mean", loss_weight=1.0)

    # Case 2: plain sum, no weight (2-input fast path), custom beta/loss_weight.
    out2 = smooth_l1_loss(pred, target, beta=0.5, reduction="sum",
                          loss_weight=2.0)
    ref2 = _reference(pred, target, beta=0.5, reduction="sum", loss_weight=2.0)

    # Case 3: larger bf16 map (1024-aligned): exercises the big-block path,
    # non-power-of-two row_tile / group selection, wide accumulator.
    shape3 = (2, 4, 240, 304)
    pred3 = jax.random.normal(k4, shape3, dtype=jnp.bfloat16)
    targ3 = jax.random.normal(k5, shape3, dtype=jnp.bfloat16)
    out3 = smooth_l1_loss(pred3, targ3, avg_factor=123.0,
                          beta=1.0, reduction="mean", loss_weight=1.0)
    ref3 = _reference(pred3, targ3, avg_factor=123.0,
                      beta=1.0, reduction="mean", loss_weight=1.0)

    # Case 4: non-1024-aligned total (3*5*7*11 = 1155): kernel on aligned prefix
    # + XLA tail fold.
    shape4 = (3, 5, 7, 11)
    pred4 = jax.random.normal(k6, shape4, dtype=jnp.float32)
    targ4 = jax.random.normal(k7, shape4, dtype=jnp.float32)
    out4 = smooth_l1_loss(pred4, targ4, beta=1.0, reduction="sum",
                          loss_weight=1.0)
    ref4 = _reference(pred4, targ4, beta=1.0, reduction="sum", loss_weight=1.0)

    # Case 5: tiny tensor (< 1024 elements): pure XLA fallback path.
    pred5 = pred4.reshape(-1)[:72]
    targ5 = targ4.reshape(-1)[:72]
    out5 = smooth_l1_loss(pred5, targ5, avg_factor=9.0,
                          beta=1.0, reduction="mean", loss_weight=3.0)
    ref5 = _reference(pred5, targ5, avg_factor=9.0,
                      beta=1.0, reduction="mean", loss_weight=3.0)

    jax.block_until_ready((out1, out2, out3, out4, out5))

    assert jnp.allclose(out1, ref1, rtol=1e-5, atol=1e-5), (out1, ref1)
    assert jnp.allclose(out2, ref2, rtol=1e-5, atol=1e-5), (out2, ref2)
    assert jnp.allclose(out3, ref3, rtol=1e-4, atol=1e-4), (out3, ref3)
    assert jnp.allclose(out4, ref4, rtol=1e-5, atol=1e-5), (out4, ref4)
    assert jnp.allclose(out5, ref5, rtol=1e-5, atol=1e-5), (out5, ref5)

    print("KERNEL_OK")
</pallas_src>

<mosaic_0001>
module attributes {stable_mosaic.version = 11 : i64} {
  func.func @_smooth_l1_kernel(%arg0: i32, %arg1: i32, %arg2: memref<16x128xf32, #tpu.memory_space<vmem>>, %arg3: memref<16x128xf32, #tpu.memory_space<vmem>>, %arg4: memref<16x128xf32, #tpu.memory_space<vmem>>, %arg5: memref<16x128xf32, #tpu.memory_space<vmem>>) attributes {dimension_semantics = [#tpu.dimension_semantics<parallel>, #tpu.dimension_semantics<arbitrary>], iteration_bounds = array<i64: 1, 1>, scalar_prefetch = 0 : i64, scratch_operands = 0 : i64, tpu.core_type = #tpu.core_type<tc>, window_params = [{transform_indices = @transform_0, window_bounds = array<i64: 16, 128>}, {transform_indices = @transform_1, window_bounds = array<i64: 16, 128>}, {transform_indices = @transform_2, window_bounds = array<i64: 16, 128>}, {transform_indices = @transform_3, window_bounds = array<i64: 16, 128>}]} {
    %c0_i32 = arith.constant 0 : i32
    %0 = arith.cmpi eq, %arg1, %c0_i32 : i32
    %1 = arith.extui %0 : i1 to i32
    %c0_i32_0 = arith.constant 0 : i32
    %2 = arith.cmpi ne, %1, %c0_i32_0 : i32
    scf.if %2 {
      %cst_12 = arith.constant 0.000000e+00 : f32
      %21 = vector.broadcast %cst_12 : f32 to vector<16x128xf32>
      %c0_13 = arith.constant 0 : index
      %c0_14 = arith.constant 0 : index
      %22 = vector.load %arg5[%c0_13, %c0_14] : memref<16x128xf32, #tpu.memory_space<vmem>>, vector<16x128xf32>
      tpu.vector_store %arg5[%c0_13, %c0_14], %21 {strides = array<i32>} : memref<16x128xf32, #tpu.memory_space<vmem>>, vector<16x128xf32>,
    } else {
    }
    %c0 = arith.constant 0 : index
    %c0_1 = arith.constant 0 : index
    %3 = vector.load %arg2[%c0, %c0_1] : memref<16x128xf32, #tpu.memory_space<vmem>>, vector<16x128xf32>
    %c0_2 = arith.constant 0 : index
    %c0_3 = arith.constant 0 : index
    %4 = vector.load %arg3[%c0_2, %c0_3] : memref<16x128xf32, #tpu.memory_space<vmem>>, vector<16x128xf32>
    %5 = arith.subf %3, %4 : vector<16x128xf32>
    %6 = math.absf %5 : vector<16x128xf32>
    %cst = arith.constant 1.000000e+00 : f32
    %7 = vector.broadcast %cst : f32 to vector<16x128xf32>
    %8 = arith.minimumf %6, %7 : vector<16x128xf32>
    %cst_4 = arith.constant 5.000000e-01 : f32
    %9 = vector.broadcast %cst_4 : f32 to vector<16x128xf32>
    %10 = arith.mulf %9, %8 : vector<16x128xf32>
    %11 = arith.mulf %10, %8 : vector<16x128xf32>
    %12 = arith.subf %6, %8 : vector<16x128xf32>
    %13 = arith.addf %11, %12 : vector<16x128xf32>
    %c0_5 = arith.constant 0 : index
    %c0_6 = arith.constant 0 : index
    %14 = vector.load %arg4[%c0_5, %c0_6] : memref<16x128xf32, #tpu.memory_space<vmem>>, vector<16x128xf32>
    %15 = arith.mulf %13, %14 : vector<16x128xf32>
    %c0_7 = arith.constant 0 : index
    %c0_8 = arith.constant 0 : index
    %16 = vector.load %arg5[%c0_7, %c0_8] : memref<16x128xf32, #tpu.memory_space<vmem>>, vector<16x128xf32>
    %17 = vector.shape_cast %15 : vector<16x128xf32> to vector<1x16x128xf32>
    %cst_9 = arith.constant dense<0.000000e+00> : vector<16x128xf32>
    %18 = vector.multi_reduction <add>, %17, %cst_9 [0] : vector<1x16x128xf32> to vector<16x128xf32>
    %19 = arith.addf %16, %18 : vector<16x128xf32>
    %c0_10 = arith.constant 0 : index
    %c0_11 = arith.constant 0 : index
    %20 = vector.load %arg5[%c0_10, %c0_11] : memref<16x128xf32, #tpu.memory_space<vmem>>, vector<16x128xf32>
    tpu.vector_store %arg5[%c0_10, %c0_11], %19 {strides = array<i32>} : memref<16x128xf32, #tpu.memory_space<vmem>>, vector<16x128xf32>,
    return
  }
  func.func @transform_0(%arg0: i32, %arg1: i32) -> (i32, i32) {
    %c1_i32 = arith.constant 1 : i32
    %0 = arith.muli %arg0, %c1_i32 : i32
    %1 = arith.addi %0, %arg1 : i32
    %c0_i32 = arith.constant 0 : i32
    %c0_i32_0 = arith.constant 0 : i32
    return %1, %c0_i32 : i32, i32
  }
  func.func @transform_1(%arg0: i32, %arg1: i32) -> (i32, i32) {
    %c1_i32 = arith.constant 1 : i32
    %0 = arith.muli %arg0, %c1_i32 : i32
    %1 = arith.addi %0, %arg1 : i32
    %c0_i32 = arith.constant 0 : i32
    %c0_i32_0 = arith.constant 0 : i32
    return %1, %c0_i32 : i32, i32
  }
  func.func @transform_2(%arg0: i32, %arg1: i32) -> (i32, i32) {
    %c1_i32 = arith.constant 1 : i32
    %0 = arith.muli %arg0, %c1_i32 : i32
    %1 = arith.addi %0, %arg1 : i32
    %c0_i32 = arith.constant 0 : i32
    %c0_i32_0 = arith.constant 0 : i32
    return %1, %c0_i32 : i32, i32
  }
  func.func @transform_3(%arg0: i32, %arg1: i32) -> (i32, i32) {
    %c0_i32 = arith.constant 0 : i32
    %c0_i32_0 = arith.constant 0 : i32
    return %arg0, %c0_i32 : i32, i32
  }
}

</mosaic_0001>

<bundles_post_ra>
// kernel: tpu_custom_call.1
= control target key start
LH: loop header
LB: loop body
LE: loop exit
PB: predicated region body
PF: predicated region fallthrough
CT: control target
= control target key end

     0   :  { %8 = vsyncpa [#allocation3], 0  ;;  %s271_s0 = inlined_call_operand.hbm [shape: f32[16,128], index: 0, kind: input, shape index: {}]   ;;  %s272_s1 = inlined_call_operand.hbm [shape: f32[16,128], index: 1, kind: input, shape index: {}]   ;;  %s273_s2 = inlined_call_operand.hbm [shape: f32[16,128], index: 2, kind: input, shape index: {}]   ;;  %s274_s3 = inlined_call_operand.hbm [shape: f32[16,128], index: 3, kind: output, shape index: {}]  }
   0x1   :  { %9 = vsyncpa [#allocation6], 0 }
   0x2   :  { %10 = vsyncpa [#allocation4], 0  ;;  %s221_s12 = smov [#allocation5]   ;;  %s222_s14 = smov [#allocation2]  }
   0x3   :  { %s36_s13 = sshll.u32 %s221_s12, 4  ;;  %s20_s15 = sshll.u32 %s222_s14, 4  ;;  %s37_s13 = int_to_ptr.vmem [resolvable:$true] %s36_s13  ;;  %s21_s15 = int_to_ptr.vmem [resolvable:$true] %s20_s15 }
   0x4   :  { %s143_s16 = scalar_lea.vmem %s37_s13, 256  ;;  %p148_p1 = scmp.lt.s32.totalorder %s37_s13, %s37_s13 }
   0x5   :  { %p144_p0 = scmp.ne.s32.totalorder %s37_s13, %s143_s16  ;;  %p149_p2 = scmp.lt.s32.totalorder %s143_s16, %s143_s16 }
   0x7   :  { %p150_p3 = por %p149_p2, %p148_p1 }
   0x9   :  { %p151_p4 = pnand %p150_p3, %p144_p0 }
   0xb   :  { %154 = shalt.err (!%p151_p4)
}
   0xc   :  { %s223_s17 = smov 128   ;;  %s224_s18 = smov 8  }
   0xd   :  { %42 = dma.hbm_to_vmem [thread:$0]  %s272_s1, 256, %s37_s13, [#allocation6], %s223_s17, %s223_s17, %s224_s18  }
   0xe   :  { %s163_s21 = scalar_lea.vmem %s21_s15, 256  ;;  %p168_p6 = scmp.lt.s32.totalorder %s21_s15, %s21_s15 }
   0xf   :  { %p164_p5 = scmp.ne.s32.totalorder %s21_s15, %s163_s21  ;;  %p169_p7 = scmp.lt.s32.totalorder %s163_s21, %s163_s21 }
  0x11   :  { %p170_p8 = por %p169_p7, %p168_p6 }
  0x13   :  { %p171_p9 = pnand %p170_p8, %p164_p5 }
  0x15   :  { %174 = shalt.err (!%p171_p9)
}
  0x16   :  { %26 = dma.hbm_to_vmem [thread:$0]  %s271_s0, 256, %s21_s15, [#allocation3], %s223_s17, %s223_s17, %s224_s18  }
  0x17   :  { %s225_s24 = smov [#allocation7]  }
  0x18   :  { %s52_s25 = sshll.u32 %s225_s24, 4  ;;  %s53_s25 = int_to_ptr.vmem [resolvable:$true] %s52_s25 }
  0x19   :  { %s183_s26 = scalar_lea.vmem %s53_s25, 256  ;;  %p188_p11 = scmp.lt.s32.totalorder %s53_s25, %s53_s25 }
  0x1a   :  { %p184_p10 = scmp.ne.s32.totalorder %s53_s25, %s183_s26  ;;  %p189_p12 = scmp.lt.s32.totalorder %s183_s26, %s183_s26 }
  0x1c   :  { %p190_p13 = por %p189_p12, %p188_p11 }
  0x1e   :  { %p191_p0 = pnand %p190_p13, %p184_p10 }
  0x20   :  { %194 = shalt.err (!%p191_p0)
}
  0x21   :  { %58 = dma.hbm_to_vmem [thread:$0]  %s273_s2, 256, %s53_s25, [#allocation6], %s223_s17, %s223_s17, %s224_s18  }
  0x22   :  { %215 = dma.done.wait [#allocation3], 256  }
  0x23   :  { %216 = vsyncadd [#allocation3], 4294967040 }
  0x24   :  { %217 = dma.done.wait [#allocation6], 512  }
  0x25   :  { %218 = vsyncadd [#allocation6], 4294966784  ;;  %v80_v0 = vld [vmem:[#allocation2] sm:$0xff]  ;;  %v82_v1 = vld [vmem:[#allocation5] sm:$0xff]  ;;  %s226_s0 = smov [#allocation8]  }
  0x26   :  { %v84_v2 = vsub.f32 %v80_v0, %v82_v1  ;;  %v81_v3 = vld [vmem:[#allocation2 + $0x8] sm:$0xff]  ;;  %v83_v4 = vld [vmem:[#allocation5 + $0x8] sm:$0xff]  ;;  %v98_v15 = vld [vmem:[#allocation7] sm:$0xff]  ;;  %s115_s2 = sshll.u32 %s226_s0, 4  ;;  %s116_s2 = int_to_ptr.vmem [resolvable:$true] %s115_s2 }
  0x27   :  { %v85_v5 = vsub.f32 %v81_v3, %v83_v4  ;;  %v99_v18 = vld [vmem:[#allocation7 + $0x8] sm:$0xff]  ;;  %s195_s28 = scalar_lea.vmem %s116_s2, 256  ;;  %p200_p2 = scmp.lt.s32.totalorder %s116_s2, %s116_s2 }
  0x28   :  { %v86_v6 = vand.u32 2147483647, %v84_v2  ;;  %p196_p1 = scmp.ne.s32.totalorder %s116_s2, %s195_s28  ;;  %p201_p3 = scmp.lt.s32.totalorder %s195_s28, %s195_s28 }
  0x29   :  { %v87_v7 = vand.u32 2147483647, %v85_v5 }
  0x2a   :  { %v88_v8 = vmin.f32 %v86_v6, 1.0  ;;  %p202_p4 = por %p201_p3, %p200_p2 }
  0x2b   :  { %v89_v9 = vmin.f32 %v87_v7, 1.0 }
  0x2c   :  { %v90_v10 = vmul.f32 0.5, %v88_v8  ;;  %v94_v11 = vsub.f32 %v86_v6, %v88_v8  ;;  %p203_p5 = pnand %p202_p4, %p196_p1 }
  0x2d   :  { %v91_v12 = vmul.f32 0.5, %v89_v9  ;;  %v95_v13 = vsub.f32 %v87_v7, %v89_v9 }
  0x2e   :  { %v92_v14 = vmul.f32 %v90_v10, %v88_v8 }
  0x2f   :  { %v93_v16 = vmul.f32 %v91_v12, %v89_v9 }
  0x30   :  { %v96_v17 = vadd.f32 %v94_v11, %v92_v14 }
  0x31   :  { %v97_v19 = vadd.f32 %v95_v13, %v93_v16 }
  0x32   :  { %v100_v20 = vmul.f32 %v98_v15, %v96_v17 }
  0x33   :  { %v101_v21 = vmul.f32 %v99_v18, %v97_v19 }
  0x34   :  { %108 = vst [vmem:[#allocation8] sm:$0xff] %v100_v20 }
  0x35   :  { %109 = vst [vmem:[#allocation8 + $0x8] sm:$0xff] %v101_v21 }
  0x36   :  { %206 = shalt.err (!%p203_p5)
}
  0x37   :  { %121 = dma.vmem_to_hbm [thread:$0]  %s116_s2, 256, %s274_s3, [#allocation4], %s223_s17, %s223_s17, %s224_s18  }
  0x38   :  { %219 = dma.done.wait [#allocation4], 256  }
  0x39   :  { %220 = vsyncadd [#allocation4], 4294967040 }
  0x3a   :  { %125 = vsyncpa [#allocation3], 1 }
  0x3b   :  { %126 = vsyncpa [#allocation6], 1 }
  0x3c   :  { %127 = vsyncpa [#allocation4], 1 }

</bundles_post_ra>
